<compile_context>
chip_gen: v7x
topology: tpu7x:2x2x1
jax: 0.10.0
libtpu: 0.0.40
codegen_flags: <defaults>
</compile_context>

<pallas_src>
import jax
import jax.numpy as jnp
from jax.experimental import pallas as pl
from jax.experimental.pallas import tpu as pltpu


def _round_up(x, m):
    return ((x + m - 1) // m) * m


def _cdiv(a, b):
    return -(-a // b)


def _default_chunk():
    # v3/v4/v5-class chips have 128x128 MXU tiles -> a 128-wide triangular
    # tile halves the cumsum FLOPs there; v6e/v7x match their 256^2 MXU.
    try:
        kind = jax.devices()[0].device_kind.lower()
    except Exception:
        return 256
    return 128 if ("v3" in kind or "v4" in kind or "v5" in kind) else 256


def _pick_row_block(rows):
    # Big row blocks amortize the per-grid-step pipeline overhead; keep an
    # even number of steps (>= 2) when there is enough work so the "parallel"
    # axis load-balances v7x's two TensorCores.  Multiples of 32 keep the
    # int8 gt blocks sublane-tile aligned.
    if rows <= 512:
        return _round_up(rows, 32)
    steps = 2 * _cdiv(rows, 2048)            # even step count, blocks <= 1024
    return _round_up(_cdiv(rows, steps), 32)


def _lovasz_tile_kernel(err_ref, gt_ref, side_ref, tri_ref, out_ref):
    # err_ref:  (RB, TK) f32   sorted hinge errors for RB chunks
    # gt_ref:   (RB, TK) int8  0/1 labels permuted by the same sort
    # side_ref: (RB, 3)  f32   per-chunk [p, q, jac_bound] with
    #                          p = gts - carry, q = gts + off - carry
    # tri_ref:  (TK, TK) bf16  upper-triangular ones, resident in VMEM
    # out_ref:  (1, TK)  f32   column sums of relu(err)*grad over the RB rows
    gt = gt_ref[...].astype(jnp.bfloat16)          # exact 0/1 upcast (VPU)
    # Local inclusive cumsum along pixels as one MXU matmul; bf16 0/1 operands
    # with f32 accumulation give exact integer counts.
    cum = jnp.dot(gt, tri_ref[...], preferred_element_type=jnp.float32)

    side = side_ref[...]
    p = side[:, 0:1]            # gts - carry
    q = side[:, 1:2]            # gts + off - carry
    jb = side[:, 2:3]           # jaccard just before this chunk (0 at off==0)

    ilane = jax.lax.broadcasted_iota(jnp.int32, cum.shape, 1)
    pos = (ilane + 1).astype(jnp.float32)          # 1-based position in chunk
    inter = p - cum                                # gts - global cumsum
    union = q + pos - cum                          # >= 1 always (no div-by-0)
    jaccard = 1.0 - inter / union

    # lovasz grad: jaccard[j] - jaccard[j-1]; the j-1 value for lane 0 comes
    # from the precomputed chunk-boundary value (0 at the global start, where
    # grad[0] = jaccard[0]).
    jac_prev = jnp.where(ilane == 0, jb, pltpu.roll(jaccard, shift=1, axis=1))
    grad = jaccard - jac_prev

    contrib = jnp.maximum(err_ref[...], 0.0) * grad
    out_ref[...] = jnp.sum(contrib, axis=0, keepdims=True)


def lovasz_hinge_loss(logits_nchw, targets_nchw, *, tk=None):
    """Equivalent of LovaszHingeLoss()(input, target) (per_image=True)."""
    if tk is None:
        tk = _default_chunk()
    B, C, H, W = logits_nchw.shape
    assert C == 1, "LovaszHingeLoss squeezes a singleton channel dim"
    N = H * W
    logits = logits_nchw.reshape(B, N).astype(jnp.float32)
    labels = targets_nchw.reshape(B, N).astype(jnp.float32)   # binary 0/1

    # Hinge errors; total positives per image come from the unsorted labels
    # (same value as after sorting, lets XLA fuse with the error computation).
    errors = 1.0 - logits * (2.0 * labels - 1.0)
    gts = jnp.sum(labels, axis=1, keepdims=True)               # (B, 1)

    # One fused key/value sort: ascending on -errors == descending on errors,
    # labels permuted by the same (stable) order.
    neg_sorted, gt_sorted = jax.lax.sort((-errors, labels), dimension=1,
                                         num_keys=1)
    err_sorted = -neg_sorted
    gt_sorted = gt_sorted.astype(jnp.int8)                     # exact 0/1

    # Pad pixels to a multiple of TK; padded slots (gt=0, err<0) contribute 0.
    n_pad = _round_up(N, tk)
    if n_pad != N:
        err_sorted = jnp.pad(err_sorted, ((0, 0), (0, n_pad - N)),
                             constant_values=-1.0)
        gt_sorted = jnp.pad(gt_sorted, ((0, 0), (0, n_pad - N)))
    nc = n_pad // tk
    rows = B * nc

    err_rows = err_sorted.reshape(rows, tk)
    gt_rows = gt_sorted.reshape(rows, tk)

    # Tiny per-chunk stats (B, nc) packed into ONE (rows, 3) side input:
    #   p  = gts - carry          q  = gts + off - carry
    #   jb = jaccard just before the chunk's first pixel (0 for first chunk)
    if nc > 1:
        chunk_sums = jnp.sum(gt_rows.reshape(B, nc, tk), axis=-1,
                             dtype=jnp.int32).astype(jnp.float32)
        carry = jnp.cumsum(chunk_sums, axis=1) - chunk_sums    # exclusive
    else:
        carry = jnp.zeros((B, nc), jnp.float32)
    off = (float(tk) * jnp.arange(nc, dtype=jnp.float32))[None, :]
    p = gts - carry
    q = gts + off - carry
    jb = jnp.where(off > 0.0, 1.0 - p / jnp.maximum(q, 1.0), 0.0)
    side = jnp.stack([p, q, jb], axis=-1).reshape(rows, 3)

    # Pack all chunks into the MXU M dimension; pad rows (err<0 -> adds 0).
    rb = _pick_row_block(rows)
    rows_p = _round_up(rows, rb)
    pad_r = rows_p - rows
    if pad_r:
        err_rows = jnp.pad(err_rows, ((0, pad_r), (0, 0)), constant_values=-1.0)
        gt_rows = jnp.pad(gt_rows, ((0, pad_r), (0, 0)))
        side = jnp.pad(side, ((0, pad_r), (0, 0)))
    num_steps = rows_p // rb

    # (TK, TK) bf16 upper-triangular ones; constant block index -> resident in
    # VMEM (no O(N^2) tri anywhere).
    tri = jnp.triu(jnp.ones((tk, tk), jnp.bfloat16))

    partial = pl.pallas_call(
        _lovasz_tile_kernel,
        out_shape=jax.ShapeDtypeStruct((num_steps, tk), jnp.float32),
        grid=(num_steps,),
        in_specs=[
            pl.BlockSpec((rb, tk), lambda i: (i, 0)),
            pl.BlockSpec((rb, tk), lambda i: (i, 0)),
            pl.BlockSpec((rb, 3), lambda i: (i, 0)),
            pl.BlockSpec((tk, tk), lambda i: (0, 0)),
        ],
        out_specs=pl.BlockSpec((1, tk), lambda i: (i, 0)),
        compiler_params=pltpu.CompilerParams(
            dimension_semantics=("parallel",),
        ),
    )(err_rows, gt_rows, side, tri)

    # Padded rows/pixels contribute exactly 0; mean over images.
    return jnp.sum(partial) / B


def _lovasz_hinge_ref(logits_nchw, targets_nchw):
    """Pure-jnp reference mirroring the PyTorch lovasz_hinge (per_image=True)."""
    B = logits_nchw.shape[0]
    logits = logits_nchw.reshape(B, -1).astype(jnp.float32)
    labels = targets_nchw.reshape(B, -1).astype(jnp.float32)

    def per_img(log, lab):
        signs = 2.0 * lab - 1.0
        errors = 1.0 - log * signs
        order = jnp.argsort(-errors)
        es = errors[order]
        gs = lab[order]
        gts = gs.sum()
        inter = gts - jnp.cumsum(gs)
        union = gts + jnp.cumsum(1.0 - gs)
        jac = 1.0 - inter / union
        grad = jnp.concatenate([jac[:1], jac[1:] - jac[:-1]])
        return jnp.sum(jnp.maximum(es, 0.0) * grad)

    return jnp.mean(jax.vmap(per_img)(logits, labels))


if __name__ == "__main__":
    key = jax.random.PRNGKey(0)
    loss_fn = jax.jit(lovasz_hinge_loss)
    # Second shape exercises the multi-chunk carry / chunk-boundary path.
    for (B, C, H, W) in [(2, 1, 16, 16), (2, 1, 32, 32)]:
        k1, k2, key = jax.random.split(key, 3)
        logits = jax.random.normal(k1, (B, C, H, W), dtype=jnp.float32)
        targets = (jax.random.uniform(k2, (B, C, H, W)) > 0.5).astype(jnp.float32)
        loss = jax.block_until_ready(loss_fn(logits, targets))
        ref = jax.block_until_ready(_lovasz_hinge_ref(logits, targets))
        assert jnp.allclose(loss, ref, atol=1e-5, rtol=1e-5), (B, H, W, loss, ref)
    print("KERNEL_OK")
</pallas_src>

<mosaic_0001>
module attributes {stable_mosaic.version = 11 : i64} {
  func.func @_lovasz_tile_kernel(%arg0: i32, %arg1: memref<32x256xf32, #tpu.memory_space<vmem>>, %arg2: memref<32x256xi8, #tpu.memory_space<vmem>>, %arg3: memref<32x3xf32, #tpu.memory_space<vmem>>, %arg4: memref<256x256xbf16, #tpu.memory_space<vmem>>, %arg5: memref<1x256xf32, #tpu.memory_space<vmem>>) attributes {dimension_semantics = [#tpu.dimension_semantics<parallel>], iteration_bounds = array<i64: 1>, scalar_prefetch = 0 : i64, scratch_operands = 0 : i64, tpu.core_type = #tpu.core_type<tc>, window_params = [{transform_indices = @transform_0, window_bounds = array<i64: 32, 256>}, {transform_indices = @transform_1, window_bounds = array<i64: 32, 256>}, {transform_indices = @transform_2, window_bounds = array<i64: 32, 3>}, {pipeline_mode = #tpu.pipeline_mode<synchronous>, transform_indices = @transform_3, window_bounds = array<i64: 256, 256>}, {transform_indices = @transform_4, window_bounds = array<i64: 1, 256>}]} {
    %c0 = arith.constant 0 : index
    %c0_0 = arith.constant 0 : index
    %0 = vector.load %arg2[%c0, %c0_0] : memref<32x256xi8, #tpu.memory_space<vmem>>, vector<32x256xi8>
    %1 = arith.sitofp %0 : vector<32x256xi8> to vector<32x256xbf16>
    %c0_1 = arith.constant 0 : index
    %c0_2 = arith.constant 0 : index
    %2 = vector.load %arg4[%c0_1, %c0_2] : memref<256x256xbf16, #tpu.memory_space<vmem>>, vector<256x256xbf16>
    %cst = arith.constant dense<0.000000e+00> : vector<32x256xf32>
    %3 = tpu.matmul %1, %2, %cst {dimension_numbers = #tpu.dot_dimension_numbers<[1], [0], [0], [1], [0, 0, 1, 1], [], []>} : vector<32x256xbf16>, vector<256x256xbf16>, vector<32x256xf32> -> vector<32x256xf32>
    %c0_3 = arith.constant 0 : index
    %c0_4 = arith.constant 0 : index
    %4 = vector.load %arg3[%c0_3, %c0_4] : memref<32x3xf32, #tpu.memory_space<vmem>>, vector<32x3xf32>
    %5 = vector.extract_strided_slice %4 {offsets = [0, 0], sizes = [32, 1], strides = [1, 1]} : vector<32x3xf32> to vector<32x1xf32>
    %6 = vector.extract_strided_slice %4 {offsets = [0, 1], sizes = [32, 1], strides = [1, 1]} : vector<32x3xf32> to vector<32x1xf32>
    %7 = vector.extract_strided_slice %4 {offsets = [0, 2], sizes = [32, 1], strides = [1, 1]} : vector<32x3xf32> to vector<32x1xf32>
    %8 = tpu.iota {dimensions = array<i32: 1>} : vector<32x256xi32>
    %c1_i32 = arith.constant 1 : i32
    %9 = vector.broadcast %c1_i32 : i32 to vector<32x256xi32>
    %10 = arith.addi %8, %9 : vector<32x256xi32>
    %11 = arith.sitofp %10 : vector<32x256xi32> to vector<32x256xf32>
    %12 = vector.broadcast %5 : vector<32x1xf32> to vector<32x256xf32>
    %13 = arith.subf %12, %3 : vector<32x256xf32>
    %14 = vector.broadcast %6 : vector<32x1xf32> to vector<32x256xf32>
    %15 = arith.addf %14, %11 : vector<32x256xf32>
    %16 = arith.subf %15, %3 : vector<32x256xf32>
    %17 = arith.divf %13, %16 : vector<32x256xf32>
    %cst_5 = arith.constant 1.000000e+00 : f32
    %18 = vector.broadcast %cst_5 : f32 to vector<32x256xf32>
    %19 = arith.subf %18, %17 : vector<32x256xf32>
    %c0_i32 = arith.constant 0 : i32
    %20 = vector.broadcast %c0_i32 : i32 to vector<32x256xi32>
    %21 = arith.cmpi eq, %8, %20 : vector<32x256xi32>
    %c1_i32_6 = arith.constant 1 : i32
    %22 = tpu.dynamic_rotate %19 by %c1_i32_6 dim 1 : vector<32x256xf32>, i32 -> vector<32x256xf32>
    %23 = vector.shape_cast %7 : vector<32x1xf32> to vector<32x1xf32>
    %24 = vector.broadcast %23 : vector<32x1xf32> to vector<32x256xf32>
    %25 = arith.select %21, %24, %22 : vector<32x256xi1>, vector<32x256xf32>
    %26 = arith.subf %19, %25 : vector<32x256xf32>
    %c0_7 = arith.constant 0 : index
    %c0_8 = arith.constant 0 : index
    %27 = vector.load %arg1[%c0_7, %c0_8] : memref<32x256xf32, #tpu.memory_space<vmem>>, vector<32x256xf32>
    %cst_9 = arith.constant 0.000000e+00 : f32
    %28 = vector.broadcast %cst_9 : f32 to vector<32x256xf32>
    %29 = arith.maximumf %27, %28 : vector<32x256xf32>
    %30 = arith.mulf %29, %26 : vector<32x256xf32>
    %cst_10 = arith.constant dense<0.000000e+00> : vector<256xf32>
    %31 = vector.multi_reduction <add>, %30, %cst_10 [0] : vector<32x256xf32> to vector<256xf32>
    %32 = vector.shape_cast %31 : vector<256xf32> to vector<1x256xf32>
    %c0_11 = arith.constant 0 : index
    %c0_12 = arith.constant 0 : index
    %33 = vector.load %arg5[%c0_11, %c0_12] : memref<1x256xf32, #tpu.memory_space<vmem>>, vector<1x256xf32>
    tpu.vector_store %arg5[%c0_11, %c0_12], %32 {strides = array<i32>} : memref<1x256xf32, #tpu.memory_space<vmem>>, vector<1x256xf32>,
    return
  }
  func.func @transform_0(%arg0: i32) -> (i32, i32) {
    %c0_i32 = arith.constant 0 : i32
    %c0_i32_0 = arith.constant 0 : i32
    return %arg0, %c0_i32 : i32, i32
  }
  func.func @transform_1(%arg0: i32) -> (i32, i32) {
    %c0_i32 = arith.constant 0 : i32
    %c0_i32_0 = arith.constant 0 : i32
    return %arg0, %c0_i32 : i32, i32
  }
  func.func @transform_2(%arg0: i32) -> (i32, i32) {
    %c0_i32 = arith.constant 0 : i32
    %c0_i32_0 = arith.constant 0 : i32
    return %arg0, %c0_i32 : i32, i32
  }
  func.func @transform_3(%arg0: i32) -> (i32, i32) {
    %c0_i32 = arith.constant 0 : i32
    %c0_i32_0 = arith.constant 0 : i32
    %c0_i32_1 = arith.constant 0 : i32
    return %c0_i32, %c0_i32_0 : i32, i32
  }
  func.func @transform_4(%arg0: i32) -> (i32, i32) {
    %c0_i32 = arith.constant 0 : i32
    %c0_i32_0 = arith.constant 0 : i32
    return %arg0, %c0_i32 : i32, i32
  }
}

</mosaic_0001>

<bundles_post_ra>
// kernel: neg.3
= control target key start
LH: loop header
LB: loop body
LE: loop exit
PB: predicated region body
PF: predicated region fallthrough
CT: control target
= control target key end

     0   :  { %s40_s0 = inlined_call_operand.vmem [shape: f32[2,256], index: 0, kind: input, shape index: {}]   ;;  %s41_s1 = inlined_call_operand.vmem [shape: f32[2,256], index: 1, kind: output, shape index: {}]  }
   0x1   :  { %v2_v0 = vld [vmem:[%s40_s0] sm:$0x3]  ;;  %v16_v1 = vld [vmem:[%s40_s0 + $0x2] sm:$0x3] }
   0x2   :  { %v5_v2 = vxor.u32 2147483648, %v2_v0  ;;  %v12_v3 = vxor.u32 2147483648, %v16_v1 }
   0x4   :  { %7 = vst [vmem:[%s41_s1] sm:$0x3] %v5_v2  ;;  %17 = vst [vmem:[%s41_s1 + $0x2] sm:$0x3] %v12_v3 }

// kernel: lovasz_hinge_loss.1
= control target key start
LH: loop header
LB: loop body
LE: loop exit
PB: predicated region body
PF: predicated region fallthrough
CT: control target
= control target key end

     0   :  { %v630_v1 = vmov 1   ;;  %v631_v27 = vmov 0   ;;  %v632_v34 = vmov 2   ;;  %v272_v45 = vlaneseq  ;;  %s853_s3 = inlined_call_operand.vmem [shape: bf16[256,256], index: 3, kind: input, shape index: {}]   ;;  %s854_s1 = inlined_call_operand.vmem [shape: s8[32,256], index: 1, kind: input, shape index: {}]   ;;  %s855_s2 = inlined_call_operand.vmem [shape: f32[32,3], index: 2, kind: input, shape index: {}]   ;;  %s856_s0 = inlined_call_operand.vmem [shape: f32[32,256], index: 0, kind: input, shape index: {}]   ;;  %s857_s4 = inlined_call_operand.vmem [shape: f32[1,256], index: 4, kind: output, shape index: {}]  }
   0x1   :  { %v566_v0 = vld [vmem:[%s853_s3 + $0x4] ss:$8 sps:$4 sm:$0xff]   ;;  %561 = vset.pattern.permute.xlu1 %v630_v1  ;;  %560 = vset.pattern.permute.xlu0 %v630_v1  ;;  %v568_v2 = vld [vmem:[%s853_s3] ss:$8 sps:$4 sm:$0xff]   ;;  %v569_v3 = vld [vmem:[%s853_s3 + $0x14] ss:$8 sps:$4 sm:$0xff]  }
   0x2   :  { %215 = vmatprep.subr.bf16.mxu0 %v566_v0  ;;  %523 = vmatprep.subr.bf16.mxu1 %v566_v0  ;;  %v571_v4 = vld [vmem:[%s853_s3 + $0x10] ss:$8 sps:$4 sm:$0xff]   ;;  %v572_v5 = vld [vmem:[%s853_s3 + $0x24] ss:$8 sps:$4 sm:$0xff]   ;;  %v574_v6 = vld [vmem:[%s853_s3 + $0x20] ss:$8 sps:$4 sm:$0xff]  }
   0x3   :  { %216 = vmatpush1.bf16.msra.mxu0 %v568_v2  ;;  %539 = vmatpush1.bf16.msra.mxu1 %v568_v2  ;;  %v575_v7 = vld [vmem:[%s853_s3 + $0x34] ss:$8 sps:$4 sm:$0xff]   ;;  %v577_v8 = vld [vmem:[%s853_s3 + $0x30] ss:$8 sps:$4 sm:$0xff]   ;;  %v578_v9 = vld [vmem:[%s853_s3 + $0x44] ss:$8 sps:$4 sm:$0xff]  }
   0x4   :  { %217 = vmatprep.subr.bf16.mxu0 %v569_v3  ;;  %524 = vmatprep.subr.bf16.mxu1 %v569_v3  ;;  %v580_v10 = vld [vmem:[%s853_s3 + $0x40] ss:$8 sps:$4 sm:$0xff]   ;;  %v581_v11 = vld [vmem:[%s853_s3 + $0x54] ss:$8 sps:$4 sm:$0xff]   ;;  %v583_v12 = vld [vmem:[%s853_s3 + $0x50] ss:$8 sps:$4 sm:$0xff]  }
   0x5   :  { %v584_v13 = vld [vmem:[%s853_s3 + $0x64] ss:$8 sps:$4 sm:$0xff]   ;;  %v586_v17 = vld [vmem:[%s853_s3 + $0x60] ss:$8 sps:$4 sm:$0xff]   ;;  %v270_v18 = vld [vmem:[%s855_s2 + $0x10] sm:$0xff]  ;;  %v775_v46 = vand.u32 127, %v272_v45 }
   0x6   :  { %v18_v14 = vld [vmem:[%s854_s1 + $0x8] sm:$0xff]  ;;  %v268_v19 = vld [vmem:[%s855_s2] sm:$0xff]  ;;  %v587_v20 = vld [vmem:[%s853_s3 + $0x74] ss:$8 sps:$4 sm:$0xff]   ;;  %316 = vperm.xlu1 %561, %v270_v18   ;;  %vm484_vm2 = vcmp.lt.s32.totalorder %v272_v45, 256 }
   0x7   :  { %218 = vmatpush1.bf16.msra.mxu0 %v571_v4  ;;  %540 = vmatpush1.bf16.msra.mxu1 %v571_v4  ;;  %v20_v15 = vunpack.c.l.s8.bf16 %v18_v14  ;;  %v22_v16 = vunpack.c.h.s8.bf16 %v18_v14  ;;  %v589_v21 = vld [vmem:[%s853_s3 + $0x70] ss:$8 sps:$4 sm:$0xff]   ;;  %v269_v23 = vld [vmem:[%s855_s2 + $0x8] sm:$0xff]  ;;  %v593_v26 = vld [vmem:[%s853_s3 + $0x94] ss:$8 sps:$4 sm:$0xff]   ;;  %v274_v47 = vadd.s32 128, %v775_v46 }
   0x8   :  { %219 = vmatprep.subr.bf16.mxu0 %v572_v5  ;;  %525 = vmatprep.subr.bf16.mxu1 %v572_v5  ;;  %v271_v22 = vld [vmem:[%s855_s2 + $0x18] sm:$0xff]  ;;  %v590_v24 = vld [vmem:[%s853_s3 + $0x84] ss:$8 sps:$4 sm:$0xff]   ;;  %v592_v25 = vld [vmem:[%s853_s3 + $0x80] ss:$8 sps:$4 sm:$0xff]   ;;  %v275_v48 = vadd.s32 1, %v775_v46 }
   0x9   :  { %247 = vmatprep.mubr.bf16.mxu0 %v20_v15  ;;  %257 = vmatprep.mubr.bf16.mxu1 %v22_v16  ;;  %v595_v28 = vld [vmem:[%s853_s3 + $0x90] ss:$8 sps:$4 sm:$0xff]   ;;  %v596_v29 = vld [vmem:[%s853_s3 + $0xa4] ss:$8 sps:$4 sm:$0xff]   ;;  %v598_v30 = vld [vmem:[%s853_s3 + $0xa0] ss:$8 sps:$4 sm:$0xff]  }
   0xa   :  { %308 = vperm.xlu0 %560, %v268_v19   ;;  %320 = vperm.xlu1 %561, %v271_v22   ;;  %v599_v31 = vld [vmem:[%s853_s3 + $0xb4] ss:$8 sps:$4 sm:$0xff]   ;;  %v601_v32 = vld [vmem:[%s853_s3 + $0xb0] ss:$8 sps:$4 sm:$0xff]   ;;  %v602_v33 = vld [vmem:[%s853_s3 + $0xc4] ss:$8 sps:$4 sm:$0xff]   ;;  %v277_v51 = vcvt.s32.f32 %v275_v48 }
   0xb   :  { %220 = vmatpush1.bf16.msra.mxu0 %v574_v6  ;;  %541 = vmatpush1.bf16.msra.mxu1 %v574_v6  ;;  %v604_v35 = vld [vmem:[%s853_s3 + $0xc0] ss:$8 sps:$4 sm:$0xff]   ;;  %v605_v36 = vld [vmem:[%s853_s3 + $0xd4] ss:$8 sps:$4 sm:$0xff]   ;;  %v607_v37 = vld [vmem:[%s853_s3 + $0xd0] ss:$8 sps:$4 sm:$0xff]  }
   0xc   :  { %221 = vmatprep.subr.bf16.mxu0 %v575_v7  ;;  %526 = vmatprep.subr.bf16.mxu1 %v575_v7  ;;  %v608_v38 = vld [vmem:[%s853_s3 + $0xe4] ss:$8 sps:$4 sm:$0xff]   ;;  %v610_v39 = vld [vmem:[%s853_s3 + $0xe0] ss:$8 sps:$4 sm:$0xff]   ;;  %v611_v40 = vld [vmem:[%s853_s3 + $0xf4] ss:$8 sps:$4 sm:$0xff]  }
   0xd   :  { %v613_v41 = vld [vmem:[%s853_s3 + $0xf0] ss:$8 sps:$4 sm:$0xff]   ;;  %v17_v42 = vld [vmem:[%s854_s1] sm:$0xff]  ;;  %v276_v49 = vadd.s32 1, %v274_v47  ;;  %s633_s1 = smov 1   ;;  %vm381_vm0 = vcmp.lt.s32.totalorder %v775_v46, 1 }
   0xe   :  { %312 = vperm.xlu0 %560, %v269_v23   ;;  %563 = vset.pattern.permute.xlu1 %v631_v27  ;;  %v19_v43 = vunpack.c.l.s8.bf16 %v17_v42  ;;  %v21_v44 = vunpack.c.h.s8.bf16 %v17_v42  ;;  %vm363_vm1 = vcmp.eq.s32.totalorder %v775_v46, 0 }
   0xf   :  { %222 = vmatpush1.bf16.msra.mxu0 %v577_v8  ;;  %542 = vmatpush1.bf16.msra.mxu1 %v577_v8  ;;  %v278_v53 = vcvt.s32.f32 %v276_v49 }
  0x10   :  { %223 = vmatprep.subr.bf16.mxu0 %v578_v9  ;;  %527 = vmatprep.subr.bf16.mxu1 %v578_v9 }
  0x11   :  { %286 = vperm.xlu1 %563, %v269_v23  }
  0x12   :  { %562 = vset.pattern.permute.xlu0 %v631_v27 }
  0x13   :  { %224 = vmatpush1.bf16.msra.mxu0 %v580_v10  ;;  %543 = vmatpush1.bf16.msra.mxu1 %v580_v10 }
  0x14   :  { %225 = vmatprep.subr.bf16.mxu0 %v581_v11  ;;  %528 = vmatprep.subr.bf16.mxu1 %v581_v11 }
  0x15   :  { %281 = vperm.xlu0 %562, %v268_v19   ;;  %291 = vperm.xlu1 %563, %v270_v18  }
  0x17   :  { %226 = vmatpush1.bf16.msra.mxu0 %v583_v12  ;;  %544 = vmatpush1.bf16.msra.mxu1 %v583_v12 }
  0x18   :  { %227 = vmatprep.subr.bf16.mxu0 %v584_v13  ;;  %529 = vmatprep.subr.bf16.mxu1 %v584_v13 }
  0x19   :  { %296 = vperm.xlu0 %562, %v271_v22   ;;  %564 = vset.pattern.permute.xlu1 %v632_v34 }
  0x1a   :  { %391 = vperm.xlu1 %564, %v268_v19  }
  0x1b   :  { %228 = vmatpush1.bf16.msra.mxu0 %v586_v17  ;;  %545 = vmatpush1.bf16.msra.mxu1 %v586_v17 }
  0x1c   :  { %229 = vmatprep.subr.bf16.mxu0 %v587_v20  ;;  %530 = vmatprep.subr.bf16.mxu1 %v587_v20 }
  0x1d   :  { %565 = vset.pattern.permute.xlu0 %v632_v34 }
  0x1e   :  { %395 = vperm.xlu0 %565, %v269_v23   ;;  %399 = vperm.xlu1 %564, %v270_v18  }
  0x1f   :  { %230 = vmatpush1.bf16.msra.mxu0 %v589_v21  ;;  %546 = vmatpush1.bf16.msra.mxu1 %v589_v21 }
  0x20   :  { %231 = vmatprep.subr.bf16.mxu0 %v590_v24  ;;  %531 = vmatprep.subr.bf16.mxu1 %v590_v24 }
  0x22   :  { %403 = vperm.xlu1 %564, %v271_v22  }
  0x23   :  { %232 = vmatpush1.bf16.msra.mxu0 %v592_v25  ;;  %547 = vmatpush1.bf16.msra.mxu1 %v592_v25 }
  0x24   :  { %233 = vmatprep.subr.bf16.mxu0 %v593_v26  ;;  %532 = vmatprep.subr.bf16.mxu1 %v593_v26 }
  0x27   :  { %234 = vmatpush1.bf16.msra.mxu0 %v595_v28  ;;  %548 = vmatpush1.bf16.msra.mxu1 %v595_v28 }
  0x28   :  { %235 = vmatprep.subr.bf16.mxu0 %v596_v29  ;;  %533 = vmatprep.subr.bf16.mxu1 %v596_v29 }
  0x2b   :  { %236 = vmatpush1.bf16.msra.mxu0 %v598_v30  ;;  %549 = vmatpush1.bf16.msra.mxu1 %v598_v30 }
  0x2c   :  { %237 = vmatprep.subr.bf16.mxu0 %v599_v31  ;;  %534 = vmatprep.subr.bf16.mxu1 %v599_v31 }
  0x2f   :  { %238 = vmatpush1.bf16.msra.mxu0 %v601_v32  ;;  %550 = vmatpush1.bf16.msra.mxu1 %v601_v32 }
  0x30   :  { %239 = vmatprep.subr.bf16.mxu0 %v602_v33  ;;  %535 = vmatprep.subr.bf16.mxu1 %v602_v33 }
  0x33   :  { %240 = vmatpush1.bf16.msra.mxu0 %v604_v35  ;;  %551 = vmatpush1.bf16.msra.mxu1 %v604_v35 }
  0x34   :  { %241 = vmatprep.subr.bf16.mxu0 %v605_v36  ;;  %536 = vmatprep.subr.bf16.mxu1 %v605_v36 }
  0x37   :  { %242 = vmatpush1.bf16.msra.mxu0 %v607_v37  ;;  %552 = vmatpush1.bf16.msra.mxu1 %v607_v37 }
  0x38   :  { %243 = vmatprep.subr.bf16.mxu0 %v608_v38  ;;  %537 = vmatprep.subr.bf16.mxu1 %v608_v38 }
  0x3b   :  { %244 = vmatpush1.bf16.msra.mxu0 %v610_v39  ;;  %553 = vmatpush1.bf16.msra.mxu1 %v610_v39 }
  0x3c   :  { %245 = vmatprep.subr.bf16.mxu0 %v611_v40  ;;  %538 = vmatprep.subr.bf16.mxu1 %v611_v40 }
  0x3f   :  { %246 = vmatpush1.bf16.msra.mxu0 %v613_v41  ;;  %554 = vmatpush1.bf16.msra.mxu1 %v613_v41 }
  0x42   :  { %248 = vmatmul.mubr.bf16.vlgmr.msra.gmra.mrb[0].mxu0 %v19_v43  ;;  %258 = vmatmul.mubr.bf16.vlgmr.msra.gmra.mrb[0].mxu1 %v21_v44 }
  0x85   :  { %v317_v52 = vpop.permute.xlu1 %316 }
  0x86   :  { %v327_v54 = vadd.f32 %v317_v52, %v277_v51  ;;  %v328_v56 = vadd.f32 %v317_v52, %v278_v53 }
  0x89   :  { %v309_v50 = vpop.permute.xlu0 %308  ;;  %v321_v59 = vpop.permute.xlu1 %320 }
  0x8a   :  { %v323_v55 = vadd.f32 %v309_v50, %v277_v51  ;;  %v324_v57 = vadd.f32 %v309_v50, %v278_v53  ;;  %v329_v7 = vadd.f32 %v321_v59, %v277_v51  ;;  %v330_v15 = vadd.f32 %v321_v59, %v278_v53 }
  0x8d   :  { %v313_v58 = vpop.permute.xlu0 %312 }
  0x8e   :  { %v325_v60 = vadd.f32 %v313_v58, %v277_v51  ;;  %v326_v11 = vadd.f32 %v313_v58, %v278_v53 }
  0x90   :  { %v287_v12 = vpop.permute.xlu1 %286 }
  0x94   :  { %v282_v17 = vpop.permute.xlu0 %281  ;;  %v292_v18 = vpop.permute.xlu1 %291 }
  0x98   :  { %v297_v33 = vpop.permute.xlu0 %296 }
 0x115   :  { %v249_v61 = vpop.f32.mrb[0].mxu0  ;;  %v259_v62 = vpop.f32.mrb[0].mxu1 }
 0x116   :  { %v331_v63 = vsub.f32 %v323_v55, %v249_v61  ;;  %v335_v0 = vsub.f32 %v327_v54, %v259_v62  ;;  %v251_v1 = vpop.f32.mrb[1].mxu0  ;;  %v261_v2 = vpop.f32.mrb[1].mxu1  ;;  %v299_v19 = vsub.f32 %v282_v17, %v249_v61  ;;  %v303_v23 = vsub.f32 %v292_v18, %v259_v62  ;;  %v423_v61 = vld [vmem:[%s856_s0 + $0x8] sm:$0xff] }
 0x117   :  { %v332_v3 = vsub.f32 %v324_v57, %v251_v1  ;;  %v336_v4 = vsub.f32 %v328_v56, %v261_v2  ;;  %v253_v5 = vpop.f32.mrb[2].mxu0  ;;  %v263_v6 = vpop.f32.mrb[2].mxu1  ;;  %v304_v25 = vsub.f32 %v292_v18, %v261_v2  ;;  %v300_v32 = vsub.f32 %v282_v17, %v251_v1  ;;  %v425_v2 = vld [vmem:[%s856_s0 + $0x18] sm:$0xff] }
 0x118   :  { %614 = vrcp.f32 %v331_v63  ;;  %v333_v8 = vsub.f32 %v325_v60, %v253_v5  ;;  %v255_v9 = vpop.f32.mrb[3].mxu0  ;;  %v265_v10 = vpop.f32.mrb[3].mxu1  ;;  %v337_v14 = vsub.f32 %v329_v7, %v263_v6  ;;  %v301_v31 = vsub.f32 %v287_v12, %v253_v5  ;;  %v422_v63 = vld [vmem:[%s856_s0] sm:$0xff]  ;;  %v424_v7 = vld [vmem:[%s856_s0 + $0x10] sm:$0xff] }
 0x119   :  { %616 = vrcp.f32 %v335_v0  ;;  %v334_v13 = vsub.f32 %v326_v11, %v255_v9  ;;  %v338_v16 = vsub.f32 %v330_v15, %v265_v10  ;;  %v302_v40 = vsub.f32 %v287_v12, %v255_v9  ;;  %v392_v54 = vpop.permute.xlu1 %391  ;;  %v396_v56 = vpop.permute.xlu0 %395 }
 0x11a   :  { %618 = vrcp.f32 %v332_v3  ;;  %v305_v41 = vsub.f32 %v297_v33, %v263_v6  ;;  %v306_v49 = vsub.f32 %v297_v33, %v265_v10  ;;  %v427_v3 = vld [vmem:[%s856_s0 + $0x28] sm:$0xff]  ;;  %v431_v6 = vmax.f32 %v423_v61, 0.0 }
 0x11b   :  { %620 = vrcp.f32 %v336_v4  ;;  %v430_v11 = vmax.f32 %v422_v63, 0.0  ;;  %v435_v17 = vmax.f32 %v427_v3, 0.0  ;;  %v634_v61 = vmov 1966171168  }
 0x11c   :  { %622 = vrcp.f32 %v333_v8 }
 0x11d   :  { %624 = vrcp.f32 %v334_v13  ;;  %v400_v55 = vpop.permute.xlu1 %399  ;;  %v426_v13 = vld [vmem:[%s856_s0 + $0x20] sm:$0xff] }
 0x11e   :  { %626 = vrcp.f32 %v337_v14 }
 0x11f   :  { %628 = vrcp.f32 %v338_v16  ;;  %v433_v16 = vmax.f32 %v425_v2, 0.0 }
 0x121   :  { %v404_v57 = vpop.permute.xlu1 %403 }
 0x122   :  { %v615_v20 = vpop.eup %614 }
 0x123   :  { %v617_v21 = vpop.eup %616  ;;  %v779_v22 = vmul.f32 %v615_v20, %v299_v19  ;;  %v432_v20 = vmax.f32 %v424_v7, 0.0 }
 0x124   :  { %v619_v24 = vpop.eup %618  ;;  %v781_v27 = vmul.f32 %v617_v21, %v303_v23  ;;  %v429_v21 = vld [vmem:[%s856_s0 + $0x38] sm:$0xff] }
 0x125   :  { %v621_v26 = vpop.eup %620  ;;  %v355_v28 = vsub.f32 1.0, %v779_v22  ;;  %v342_v37 = vmul.f32 %v619_v24, %v300_v32 }
 0x126   :  { %v623_v29 = vpop.eup %622  ;;  %v784_v30 = vmul.f32 %v621_v26, %v304_v25  ;;  %v359_v38 = vsub.f32 1.0, %v781_v27  ;;  %v428_v27 = vld [vmem:[%s856_s0 + $0x30] sm:$0xff] }
 0x127   :  { %365 = vrot.lane.b32.xlu0 %v355_v28, %s633_s1  ;;  %v786_v34 = vmul.f32 %v623_v29, %v301_v31  ;;  %v625_v36 = vpop.eup %624  ;;  %v356_v48 = vsub.f32 1.0, %v342_v37  ;;  %v434_v29 = vmax.f32 %v426_v13, 0.0 }
 0x128   :  { %v360_v35 = vsub.f32 1.0, %v784_v30  ;;  %v627_v39 = vpop.eup %626  ;;  %v346_v42 = vmul.f32 %v625_v36, %v302_v40 }
 0x129   :  { %v357_v43 = vsub.f32 1.0, %v786_v34  ;;  %v629_v44 = vpop.eup %628  ;;  %v791_v47 = vmul.f32 %v627_v39, %v305_v41  ;;  %v437_v34 = vmax.f32 %v429_v21, 0.0  ;;  %v436_v39 = vmax.f32 %v428_v27, 0.0 }
 0x12a   :  { %377 = vrot.lane.b32.xlu1 %v360_v35, %s633_s1  ;;  %v358_v50 = vsub.f32 1.0, %v346_v42  ;;  %v354_v51 = vmul.f32 %v629_v44, %v306_v49 }
 0x12b   :  { %369 = vrot.lane.b32.xlu0 %v359_v38, %s633_s1  ;;  %v361_v52 = vsub.f32 1.0, %v791_v47 }
 0x12c   :  { %v362_v53 = vsub.f32 1.0, %v354_v51 }
 0x12e   :  { %367 = vrot.lane.b32.xlu1 %v357_v43, %s633_s1 }
 0x12f   :  { %373 = vrot.lane.b32.xlu0 %v356_v48, %s633_s1 }
 0x132   :  { %375 = vrot.lane.b32.xlu1 %v358_v50, %s633_s1 }
 0x133   :  { %371 = vrot.lane.b32.xlu0 %v361_v52, %s633_s1 }
 0x136   :  { %379 = vrot.lane.b32.xlu1 %v362_v53, %s633_s1 }
 0x199   :  { %v366_v58 = vpop.permute.xlu0 %365 }
 0x19c   :  { %v378_v59 = vpop.permute.xlu1 %377 }
 0x19d   :  { %v370_v60 = vpop.permute.xlu0 %369 }
 0x19e   :  { %v388_v0 = vsel %vm381_vm0, %v378_v59, %v370_v60  ;;  %v384_v8 = vsel %vm381_vm0, %v370_v60, %v378_v59 }
 0x19f   :  { %v410_v12 = vsel %vm363_vm1, %v400_v55, %v388_v0  ;;  %v419_v22 = vsub.f32 %v360_v35, %v384_v8 }
 0x1a0   :  { %v368_v62 = vpop.permute.xlu1 %367 }
 0x1a1   :  { %v374_v1 = vpop.permute.xlu0 %373  ;;  %v443_v40 = vmul.f32 %v435_v17, %v419_v22 }
 0x1a2   :  { %v382_v4 = vsel %vm381_vm0, %v366_v58, %v374_v1  ;;  %v386_v5 = vsel %vm381_vm0, %v374_v1, %v366_v58  ;;  %v471_v1 = vshrl.u32 %v272_v45, 7 }
 0x1a3   :  { %v406_v9 = vsel %vm363_vm1, %v392_v54, %v386_v5  ;;  %v415_v10 = vsub.f32 %v356_v48, %v382_v4 }
 0x1a4   :  { %v414_v14 = vsub.f32 %v355_v28, %v406_v9  ;;  %v376_v15 = vpop.permute.xlu1 %375  ;;  %v418_v28 = vsub.f32 %v359_v38, %v410_v12 }
 0x1a5   :  { %v383_v18 = vsel %vm381_vm0, %v368_v62, %v376_v15  ;;  %v387_v19 = vsel %vm381_vm0, %v376_v15, %v368_v62  ;;  %v439_v23 = vmul.f32 %v431_v6, %v415_v10  ;;  %v372_v26 = vpop.permute.xlu0 %371  ;;  %v468_v62 = vunpack.c.l.s4 %v634_v61 }
 0x1a6   :  { %v408_v24 = vsel %vm363_vm1, %v396_v56, %v387_v19  ;;  %v417_v25 = vsub.f32 %v358_v50, %v383_v18  ;;  %v438_v30 = vmul.f32 %v430_v11, %v414_v14  ;;  %v442_v44 = vmul.f32 %v434_v29, %v418_v28 }
 0x1a7   :  { %v416_v31 = vsub.f32 %v357_v43, %v408_v24  ;;  %v469_v0 = vunpack.c.0.s8 %v468_v62 }
 0x1a8   :  { %v441_v32 = vmul.f32 %v433_v16, %v417_v25  ;;  %v380_v33 = vpop.permute.xlu1 %379 }
 0x1a9   :  { %v440_v36 = vmul.f32 %v432_v20, %v416_v31  ;;  %v385_v35 = vsel %vm381_vm0, %v372_v26, %v380_v33  ;;  %v389_v37 = vsel %vm381_vm0, %v380_v33, %v372_v26  ;;  %v472_v4 = vsub.s32 %v469_v0, %v471_v1 }
 0x1aa   :  { %v455_v41 = vadd.f32 %v441_v32, %v439_v23  ;;  %v412_v42 = vsel %vm363_vm1, %v404_v57, %v389_v37  ;;  %v421_v38 = vsub.f32 %v362_v53, %v385_v35 }
 0x1ab   :  { %v446_v48 = vadd.f32 %v440_v36, %v438_v30  ;;  %v420_v43 = vsub.f32 %v361_v52, %v412_v42 }
 0x1ac   :  { %v445_v49 = vmul.f32 %v437_v34, %v421_v38  ;;  %v456_v50 = vadd.f32 %v455_v41, %v443_v40 }
 0x1ad   :  { %v444_v51 = vmul.f32 %v436_v39, %v420_v43  ;;  %v447_v54 = vadd.f32 %v446_v48, %v442_v44 }
 0x1ae   :  { %v457_v55 = vadd.f32 %v456_v50, %v445_v49 }
 0x1af   :  { %v448_v56 = vadd.f32 %v447_v54, %v444_v51 }
 0x1b0   :  { %v458_v58 = vrot.slane %v457_v55, 4 }
 0x1b1   :  { %v449_v59 = vrot.slane %v448_v56, 4 }
 0x1b2   :  { %v459_v60 = vadd.f32 %v458_v58, %v457_v55 }
 0x1b3   :  { %v450_v63 = vadd.f32 %v449_v59, %v448_v56 }
 0x1b4   :  { %v460_v46 = vrot.slane %v459_v60, 2 }
 0x1b5   :  { %v451_v57 = vrot.slane %v450_v63, 2 }
 0x1b6   :  { %v461_v53 = vadd.f32 %v460_v46, %v459_v60 }
 0x1b7   :  { %v452_v47 = vadd.f32 %v451_v57, %v450_v63 }
 0x1b8   :  { %v462_v52 = vrot.slane %v461_v53, 1 }
 0x1b9   :  { %v453_v2 = vrot.slane %v452_v47, 1 }
 0x1ba   :  { %v463_v3 = vadd.f32 %v462_v52, %v461_v53 }
 0x1bb   :  { %v454_v5 = vadd.f32 %v453_v2, %v452_v47 }
 0x1bd   :  { %v466_v6 = vcombine.low %v454_v5, %v463_v3 }
 0x1bf   :  { %v473_v7 = vrot.slane %v466_v6, %v472_v4 }
 0x1c1   :  { %v480_v8 = vrot.slane %v473_v7, %v472_v4 }
 0x1c3   :  { %486 = vst.msk [vmem:[%s857_s4] sm:$0x3] %vm484_vm2, %v480_v8 }

</bundles_post_ra>
